<compile_context>
chip_gen: v7x
topology: tpu7x:2x2x1
jax: 0.10.0
libtpu: 0.0.40
codegen_flags: <defaults>
</compile_context>

<pallas_src>
import functools

import jax
import jax.numpy as jnp
from jax.experimental import pallas as pl
from jax.experimental.pallas import tpu as pltpu


def _round_up(x, m):
    return ((x + m - 1) // m) * m


def _exact_tile(dim, preferred, align):
    """Largest t <= preferred with dim % t == 0 and t % align == 0, else None."""
    t = (min(preferred, dim) // align) * align
    while t >= align:
        if dim % t == 0:
            return t
        t -= align
    return None


# ---------------------------------------------------------------------------
# Fused linear:  y[M, N] = x[M, K] @ w[K, N] (+ b[1, N])
# ---------------------------------------------------------------------------
def _linear_bias_kernel(x_ref, w_ref, b_ref, o_ref):
    acc = jnp.dot(x_ref[...], w_ref[...], preferred_element_type=jnp.float32)
    o_ref[...] = (acc + b_ref[...].astype(jnp.float32)).astype(o_ref.dtype)


def _linear_nobias_kernel(x_ref, w_ref, o_ref):
    o_ref[...] = jnp.dot(
        x_ref[...], w_ref[...], preferred_element_type=jnp.float32
    ).astype(o_ref.dtype)


def _linear_bias_kloop_kernel(x_ref, w_ref, b_ref, o_ref, acc_ref):
    k = pl.program_id(2)

    @pl.when(k == 0)
    def _():
        acc_ref[...] = jnp.zeros_like(acc_ref)

    acc_ref[...] += jnp.dot(x_ref[...], w_ref[...],
                            preferred_element_type=jnp.float32)

    @pl.when(k == pl.num_programs(2) - 1)
    def _():
        o_ref[...] = (acc_ref[...] + b_ref[...].astype(jnp.float32)).astype(o_ref.dtype)


def _linear_nobias_kloop_kernel(x_ref, w_ref, o_ref, acc_ref):
    k = pl.program_id(2)

    @pl.when(k == 0)
    def _():
        acc_ref[...] = jnp.zeros_like(acc_ref)

    acc_ref[...] += jnp.dot(x_ref[...], w_ref[...],
                            preferred_element_type=jnp.float32)

    @pl.when(k == pl.num_programs(2) - 1)
    def _():
        o_ref[...] = acc_ref[...].astype(o_ref.dtype)


def linear(x, w, b=None, *, tm=512, tn=512, tk=512, max_full_k=1024):
    """x: (M, K), w: (K, N), optional b: (N,) -> (M, N)."""
    M, K = x.shape
    Kw, N = w.shape
    assert K == Kw

    # Row tile: fixed size, cdiv grid (padded last block) -- never full huge M.
    tm_ = min(tm, M)
    grid_m = pl.cdiv(M, tm_)

    # Column tile: exact divisor when possible, otherwise cdiv-padded
    # (padded output columns are masked on store, so correctness holds).
    if N <= tn:
        tn_ = N
    else:
        tn_ = _exact_tile(N, tn, 128) or tn
    grid_n = pl.cdiv(N, tn_)

    # Reduction tile: must divide K exactly (padding a contraction is unsafe).
    if K <= max_full_k:
        tk_ = K
    else:
        tk_ = _exact_tile(K, tk, 128) or _exact_tile(K, tk, 8) or K
    grid_k = K // tk_

    has_bias = b is not None
    args = [x, w] + ([b.reshape(1, N)] if has_bias else [])

    if grid_k == 1:
        grid = (grid_m, grid_n)
        in_specs = [
            pl.BlockSpec((tm_, K), lambda i, j: (i, 0)),
            pl.BlockSpec((K, tn_), lambda i, j: (0, j)),
        ]
        if has_bias:
            in_specs.append(pl.BlockSpec((1, tn_), lambda i, j: (0, j)))
        out_specs = pl.BlockSpec((tm_, tn_), lambda i, j: (i, j))
        kernel = _linear_bias_kernel if has_bias else _linear_nobias_kernel
        scratch = []
        dims = ("parallel", "parallel")
    else:
        grid = (grid_m, grid_n, grid_k)
        in_specs = [
            pl.BlockSpec((tm_, tk_), lambda i, j, k: (i, k)),
            pl.BlockSpec((tk_, tn_), lambda i, j, k: (k, j)),
        ]
        if has_bias:
            in_specs.append(pl.BlockSpec((1, tn_), lambda i, j, k: (0, j)))
        out_specs = pl.BlockSpec((tm_, tn_), lambda i, j, k: (i, j))
        kernel = _linear_bias_kloop_kernel if has_bias else _linear_nobias_kloop_kernel
        scratch = [pltpu.VMEM((tm_, tn_), jnp.float32)]
        dims = ("parallel", "parallel", "arbitrary")

    return pl.pallas_call(
        kernel,
        out_shape=jax.ShapeDtypeStruct((M, N), x.dtype),
        grid_spec=pltpu.PrefetchScalarGridSpec(
            num_scalar_prefetch=0,
            grid=grid,
            in_specs=in_specs,
            out_specs=out_specs,
            scratch_shapes=scratch,
        ),
        compiler_params=pltpu.CompilerParams(dimension_semantics=dims),
    )(*args)


# ---------------------------------------------------------------------------
# Attention core: one (batch, q-tile) per grid step, all heads per step.
#   q_ref: (H, tq, Dh)   k_ref, v_ref: (H, N, Dh)   o_ref: (tq, H, Dh)
# Output is produced directly in (B, N, H, Dh) layout (no wrapper transpose).
# ---------------------------------------------------------------------------
def _mha_kernel(q_ref, k_ref, v_ref, o_ref, *, scale, num_heads):
    for h in range(num_heads):              # static unrolled; 2-D MXU dots
        q = q_ref[h] * scale                # scale folded into q: (tq, Dh)
        s = jax.lax.dot_general(            # (tq, N) f32, contract Dh
            q, k_ref[h], (((1,), (1,)), ((), ())),
            preferred_element_type=jnp.float32)
        m = jnp.max(s, axis=-1, keepdims=True)
        p = jnp.exp(s - m)                  # unnormalized probs, f32
        l = jnp.sum(p, axis=-1, keepdims=True)
        o = jnp.dot(p.astype(v_ref.dtype), v_ref[h],
                    preferred_element_type=jnp.float32)      # (tq, Dh)
        o = o * pl.reciprocal(l, approx=True)  # deferred normalization
        o_ref[:, h, :] = o.astype(o_ref.dtype)


def mha(q, k, v, scale, *, tq_max=256):
    """q, k, v: (B, H, N, Dh) -> (B, N, H, Dh)."""
    B, H, N, Dh = q.shape

    # TODO(synk): for N >~ 2048 switch to an online-softmax (flash) inner KV
    # grid axis; for ViT sequence lengths the full (tq, N) score tile is fine.
    if N <= tq_max:
        tq = N
        if B == 1 and N >= 16:
            # Ensure >= 2 q-tiles so both v7x TensorCores get work.
            tq = _round_up(pl.cdiv(N, 2), 8)
    else:
        tq = tq_max
    grid = (B, pl.cdiv(N, tq))

    kernel = functools.partial(_mha_kernel, scale=scale, num_heads=H)
    return pl.pallas_call(
        kernel,
        out_shape=jax.ShapeDtypeStruct((B, N, H, Dh), q.dtype),
        grid_spec=pltpu.PrefetchScalarGridSpec(
            num_scalar_prefetch=0,
            grid=grid,
            in_specs=[
                pl.BlockSpec((None, H, tq, Dh), lambda b, i: (b, 0, i, 0)),
                pl.BlockSpec((None, H, N, Dh), lambda b, i: (b, 0, 0, 0)),
                pl.BlockSpec((None, H, N, Dh), lambda b, i: (b, 0, 0, 0)),
            ],
            out_specs=pl.BlockSpec((None, tq, H, Dh), lambda b, i: (b, i, 0, 0)),
        ),
        compiler_params=pltpu.CompilerParams(
            dimension_semantics=("parallel", "parallel")),
    )(q, k, v)


# ---------------------------------------------------------------------------
# Module mirror of the PyTorch Attention
# ---------------------------------------------------------------------------
class Attention:
    def __init__(self, dim, num_heads=8, qkv_bias=False, qk_scale=None,
                 attn_drop_ration=0.0, proj_drop_ration=0.0,
                 *, param_key=None, dtype=jnp.float32):
        assert dim % num_heads == 0
        self.dim = dim
        self.num_heads = num_heads
        head_dim = dim // num_heads
        self.scale = qk_scale or head_dim ** (-0.5)
        # TODO(synk): attn_drop / proj_drop with nonzero rate not implemented;
        # defaults are 0.0 -> identity (matches eval-mode / default semantics).
        self.attn_drop_ration = attn_drop_ration
        self.proj_drop_ration = proj_drop_ration

        if param_key is None:
            param_key = jax.random.PRNGKey(0)
        k1, k2, k3, k4 = jax.random.split(param_key, 4)
        lim = 1.0 / (dim ** 0.5)  # torch.nn.Linear default init range
        # Stored as (in, out) so kernels compute x @ W (same math as torch x @ W^T).
        self.w_qkv = jax.random.uniform(k1, (dim, 3 * dim), dtype, -lim, lim)
        self.b_qkv = (jax.random.uniform(k2, (3 * dim,), dtype, -lim, lim)
                      if qkv_bias else None)
        self.w_proj = jax.random.uniform(k3, (dim, dim), dtype, -lim, lim)
        self.b_proj = jax.random.uniform(k4, (dim,), dtype, -lim, lim)

    def __call__(self, x):
        B, N, C = x.shape
        H = self.num_heads
        Dh = C // H

        # 1) fused qkv projection (bias skipped entirely when qkv_bias=False)
        qkv = linear(x.reshape(B * N, C), self.w_qkv, self.b_qkv)       # (B*N, 3C)

        # 2) split heads — single XLA transpose (layout plumbing)
        qkv = qkv.reshape(B, N, 3, H, Dh).transpose(2, 0, 3, 1, 4)      # (3,B,H,N,Dh)
        q, k, v = qkv[0], qkv[1], qkv[2]

        # 3) attention kernel; output already in (B, N, H, Dh), so the
        #    reshape to (B*N, C) is free (no transpose round trip through HBM)
        o = mha(q, k, v, self.scale)                                    # (B, N, H, Dh)

        # 4) output projection; proj_drop(0.0) = identity
        y = linear(o.reshape(B * N, C), self.w_proj, self.b_proj)       # (B*N, C)
        return y.reshape(B, N, C)


# ---------------------------------------------------------------------------
# Self-test vs a pure-JAX reference
# ---------------------------------------------------------------------------
def _ref_forward(x, attn):
    hp = jax.lax.Precision.HIGHEST
    B, N, C = x.shape
    H, Dh = attn.num_heads, C // attn.num_heads
    qkv = jnp.dot(x, attn.w_qkv, precision=hp)
    if attn.b_qkv is not None:
        qkv = qkv + attn.b_qkv
    qkv = qkv.reshape(B, N, 3, H, Dh).transpose(2, 0, 3, 1, 4)
    q, k, v = qkv[0], qkv[1], qkv[2]
    s = jnp.einsum("bhqd,bhkd->bhqk", q, k, precision=hp) * attn.scale
    p = jax.nn.softmax(s, axis=-1)
    o = jnp.einsum("bhqk,bhkd->bhqd", p, v, precision=hp)
    o = o.transpose(0, 2, 1, 3).reshape(B, N, C)
    return jnp.dot(o, attn.w_proj, precision=hp) + attn.b_proj


if __name__ == "__main__":
    key = jax.random.PRNGKey(0)

    # Case 1: small shape, no qkv bias (module default), no tile padding.
    k1, k2, key = jax.random.split(key, 3)
    B, N, dim, heads = 2, 8, 32, 4
    x1 = jax.random.normal(k1, (B, N, dim), dtype=jnp.float32)
    attn1 = Attention(dim, num_heads=heads, qkv_bias=False, param_key=k2)
    out1 = jax.block_until_ready(attn1(x1))
    assert out1.shape == (B, N, dim)
    ref1 = _ref_forward(x1, attn1)
    err1 = float(jnp.max(jnp.abs(out1 - ref1)))
    assert jnp.allclose(out1, ref1, atol=2e-2, rtol=2e-2), err1

    # Case 2: qkv bias on, M = 3*197 = 591 > 512 exercises the cdiv-padded
    # row-tile path of the linear kernel.
    k3, k4 = jax.random.split(key)
    B, N, dim, heads = 3, 197, 64, 8
    x2 = jax.random.normal(k3, (B, N, dim), dtype=jnp.float32)
    attn2 = Attention(dim, num_heads=heads, qkv_bias=True, param_key=k4)
    out2 = jax.block_until_ready(attn2(x2))
    assert out2.shape == (B, N, dim)
    ref2 = _ref_forward(x2, attn2)
    err2 = float(jnp.max(jnp.abs(out2 - ref2)))
    assert jnp.allclose(out2, ref2, atol=2e-2, rtol=2e-2), err2

    print("KERNEL_OK")
</pallas_src>

<mosaic_0001>
module attributes {stable_mosaic.version = 11 : i64} {
  func.func @_linear_nobias_kernel(%arg0: i32, %arg1: i32, %arg2: memref<16x32xf32, #tpu.memory_space<vmem>>, %arg3: memref<32x96xf32, #tpu.memory_space<vmem>>, %arg4: memref<16x96xf32, #tpu.memory_space<vmem>>) attributes {dimension_semantics = [#tpu.dimension_semantics<parallel>, #tpu.dimension_semantics<parallel>], iteration_bounds = array<i64: 1, 1>, scalar_prefetch = 0 : i64, scratch_operands = 0 : i64, tpu.core_type = #tpu.core_type<tc>, window_params = [{transform_indices = @transform_0, window_bounds = array<i64: 16, 32>}, {transform_indices = @transform_1, window_bounds = array<i64: 32, 96>}, {transform_indices = @transform_2, window_bounds = array<i64: 16, 96>}]} {
    %c0 = arith.constant 0 : index
    %c0_0 = arith.constant 0 : index
    %0 = vector.load %arg2[%c0, %c0_0] : memref<16x32xf32, #tpu.memory_space<vmem>>, vector<16x32xf32>
    %c0_1 = arith.constant 0 : index
    %c0_2 = arith.constant 0 : index
    %1 = vector.load %arg3[%c0_1, %c0_2] : memref<32x96xf32, #tpu.memory_space<vmem>>, vector<32x96xf32>
    %cst = arith.constant dense<0.000000e+00> : vector<16x96xf32>
    %2 = tpu.matmul %0, %1, %cst {dimension_numbers = #tpu.dot_dimension_numbers<[1], [0], [0], [1], [0, 0, 1, 1], [], []>} : vector<16x32xf32>, vector<32x96xf32>, vector<16x96xf32> -> vector<16x96xf32>
    %c0_3 = arith.constant 0 : index
    %c0_4 = arith.constant 0 : index
    %3 = vector.load %arg4[%c0_3, %c0_4] : memref<16x96xf32, #tpu.memory_space<vmem>>, vector<16x96xf32>
    tpu.vector_store %arg4[%c0_3, %c0_4], %2 {strides = array<i32>} : memref<16x96xf32, #tpu.memory_space<vmem>>, vector<16x96xf32>,
    return
  }
  func.func @transform_0(%arg0: i32, %arg1: i32) -> (i32, i32) {
    %c0_i32 = arith.constant 0 : i32
    %c0_i32_0 = arith.constant 0 : i32
    return %arg0, %c0_i32 : i32, i32
  }
  func.func @transform_1(%arg0: i32, %arg1: i32) -> (i32, i32) {
    %c0_i32 = arith.constant 0 : i32
    %c0_i32_0 = arith.constant 0 : i32
    return %c0_i32, %arg1 : i32, i32
  }
  func.func @transform_2(%arg0: i32, %arg1: i32) -> (i32, i32) {
    %c0_i32 = arith.constant 0 : i32
    return %arg0, %arg1 : i32, i32
  }
}

</mosaic_0001>

<bundles_post_ra>
// kernel: tpu_custom_call.1
= control target key start
LH: loop header
LB: loop body
LE: loop exit
PB: predicated region body
PF: predicated region fallthrough
CT: control target
= control target key end

     0   :  { %7 = vsyncpa [#allocation3], 0  ;;  %s318_s0 = inlined_call_operand.hbm [shape: f32[16,32], index: 0, kind: input, shape index: {}]   ;;  %s319_s1 = inlined_call_operand.hbm [shape: f32[32,96], index: 1, kind: input, shape index: {}]   ;;  %s320_s2 = inlined_call_operand.hbm [shape: f32[16,96], index: 2, kind: output, shape index: {}]  }
   0x1   :  { %8 = vsyncpa [#allocation6], 0 }
   0x2   :  { %9 = vsyncpa [#allocation4], 0  ;;  %s253_s9 = smov [#allocation2]   ;;  %s181_s13 = scalar_lea.hbm %s318_s0, 256 }
   0x3   :  { %s15_s10 = sshll.u32 %s253_s9, 4  ;;  %p182_p0 = scmp.ne.s32.totalorder %s318_s0, %s181_s13  ;;  %s16_s10 = int_to_ptr.vmem [resolvable:$true] %s15_s10 }
   0x4   :  { %p185_p1 = scmp.lt.u32.totalorder %s181_s13, %s318_s0 }
   0x6   :  { %p187_p2 = pnand %p185_p1, %p182_p0 }
   0x8   :  { %190 = shalt.err (!%p187_p2)
}
   0x9   :  { %s191_s18 = scalar_lea.vmem %s16_s10, 256  ;;  %p196_p4 = scmp.lt.s32.totalorder %s16_s10, %s16_s10 }
   0xa   :  { %p192_p3 = scmp.ne.s32.totalorder %s16_s10, %s191_s18  ;;  %p197_p5 = scmp.lt.s32.totalorder %s191_s18, %s191_s18 }
   0xc   :  { %p198_p6 = por %p197_p5, %p196_p4 }
   0xe   :  { %p199_p7 = pnand %p198_p6, %p192_p3 }
  0x10   :  { %202 = shalt.err (!%p199_p7)
}
  0x11   :  { %s254_s19 = smov 128   ;;  %s255_s20 = smov 8  }
  0x12   :  { %21 = dma.hbm_to_vmem [thread:$0]  %s318_s0, 256, %s16_s10, [#allocation3], %s254_s19, %s254_s19, %s255_s20  }
  0x13   :  { %s256_s23 = smov [#allocation5]   ;;  %s203_s27 = scalar_lea.hbm %s319_s1, 512 }
  0x14   :  { %s27_s24 = sshll.u32 %s256_s23, 4  ;;  %p204_p8 = scmp.ne.s32.totalorder %s319_s1, %s203_s27  ;;  %s28_s24 = int_to_ptr.vmem [resolvable:$true] %s27_s24 }
  0x15   :  { %p207_p9 = scmp.lt.u32.totalorder %s203_s27, %s319_s1 }
  0x17   :  { %p209_p10 = pnand %p207_p9, %p204_p8 }
  0x19   :  { %212 = shalt.err (!%p209_p10)
}
  0x1a   :  { %s213_s4 = scalar_lea.vmem %s28_s24, 512  ;;  %p218_p12 = scmp.lt.s32.totalorder %s28_s24, %s28_s24 }
  0x1b   :  { %p214_p11 = scmp.ne.s32.totalorder %s28_s24, %s213_s4  ;;  %p219_p13 = scmp.lt.s32.totalorder %s213_s4, %s213_s4 }
  0x1d   :  { %p220_p0 = por %p219_p13, %p218_p12 }
  0x1f   :  { %p221_p1 = pnand %p220_p0, %p214_p11 }
  0x21   :  { %224 = shalt.err (!%p221_p1)
}
  0x22   :  { %33 = dma.hbm_to_vmem [thread:$0]  %s319_s1, 512, %s28_s24, [#allocation6], %s254_s19, %s254_s19, %s255_s20  }
  0x23   :  { %247 = dma.done.wait [#allocation3], 256  }
  0x24   :  { %248 = vsyncadd [#allocation3], 4294967040 }
  0x25   :  { %249 = dma.done.wait [#allocation6], 512  }
  0x26   :  { %250 = vsyncadd [#allocation6], 4294966784  ;;  %vm46_vm0 = vcmask 261120   ;;  %v42_v0 = vld [vmem:[#allocation5] sm:$0xff]  ;;  %v43_v1 = vld [vmem:[#allocation5 + $0x8] sm:$0xff]  ;;  %s257_s1 = smov [#allocation7]  }
  0x27   :  { %v44_v2 = vld [vmem:[#allocation5 + $0x10] sm:$0xff]  ;;  %v168_v3 = vpack.c.bf16 %v43_v1, %v42_v0  ;;  %v45_v4 = vld [vmem:[#allocation5 + $0x18] sm:$0xff]  ;;  %s136_s6 = sshll.u32 %s257_s1, 4  ;;  %vm128_vm1 = vcmask 785408   ;;  %s137_s6 = int_to_ptr.vmem [resolvable:$true] %s136_s6 }
  0x28   :  { %v40_v5 = vld [vmem:[#allocation2] sm:$0xff]  ;;  %v172_v6 = vpack.c.bf16 %v45_v4, %v44_v2  ;;  %v41_v7 = vld [vmem:[#allocation2 + $0x8] sm:$0xff]  ;;  %s225_s7 = scalar_lea.vmem %s137_s6, 256  ;;  %p230_p3 = scmp.lt.s32.totalorder %s137_s6, %s137_s6 }
  0x29   :  { %165 = vmatprep.mubr.msk.f32.mxu0 %vm46_vm0, %v40_v5  ;;  %169 = vmatprep.subr.bf16.mxu0 %v168_v3  ;;  %p226_p2 = scmp.ne.s32.totalorder %s137_s6, %s225_s7  ;;  %p231_p4 = scmp.lt.s32.totalorder %s225_s7, %s225_s7 }
  0x2a   :  { %171 = vmatpush3.bf16.msra.mxu0 %v168_v3 }
  0x2b   :  { %173 = vmatprep.subr.bf16.mxu0 %v172_v6  ;;  %p232_p5 = por %p231_p4, %p230_p3 }
  0x2d   :  { %p233_p6 = pnand %p232_p5, %p226_p2 }
  0x2e   :  { %175 = vmatpush3.bf16.msra.mxu0 %v172_v6 }
  0x31   :  { %166 = vmatmul.mubr.msk.f32.vlgmr.msra.gmra.mrb[0].mxu0 %vm46_vm0, %v41_v7 }
 0x104   :  { %v167_v8 = vpop.f32.mrb[0].mxu0 }
 0x105   :  { %130 = vst.msk [vmem:[#allocation7 + $0x8] sm:$0xff] %vm128_vm1, %v167_v8  ;;  %v119_v9 = vpop.f32.mrb[1].mxu0 }
 0x106   :  { %129 = vst.msk [vmem:[#allocation7] sm:$0xff] %vm128_vm1, %v119_v9 }
 0x107   :  { %236 = shalt.err (!%p233_p6)
}
 0x108   :  { %s237_s10 = scalar_lea.hbm %s320_s2, 256 }
 0x109   :  { %p238_p7 = scmp.ne.s32.totalorder %s320_s2, %s237_s10  ;;  %p241_p8 = scmp.lt.u32.totalorder %s237_s10, %s320_s2 }
 0x10b   :  { %p243_p9 = pnand %p241_p8, %p238_p7 }
 0x10d   :  { %246 = shalt.err (!%p243_p9)
}
 0x10e   :  { %142 = dma.vmem_to_hbm [thread:$0]  %s137_s6, 256, %s320_s2, [#allocation4], %s254_s19, %s254_s19, %s255_s20  }
 0x10f   :  { %251 = dma.done.wait [#allocation4], 256  }
 0x110   :  { %252 = vsyncadd [#allocation4], 4294967040 }
 0x111   :  { %146 = vsyncpa [#allocation3], 1 }
 0x112   :  { %147 = vsyncpa [#allocation6], 1 }
 0x113   :  { %148 = vsyncpa [#allocation4], 1 }

</bundles_post_ra>
